<compile_context>
chip_gen: v5e
topology: v5e:2x2
jax: 0.10.0
libtpu: 0.0.40
codegen_flags: <defaults>
</compile_context>

<pallas_src>
import jax
import jax.numpy as jnp
from jax import lax
from jax.experimental import pallas as pl
from jax.experimental.pallas import tpu as pltpu

A_PAD = 128  # lane-dense Q-head output width


def lstm_qnet_kernel(x_ref, h0_ref, c0_ref, wih_ref, whh_ref, b_ref,
                     wq_ref, bq_ref,
                     q_ref, hN_ref, cN_ref):
    """Whole-sequence LSTM + Q head in one kernel invocation.

    x_ref   : (T*B, D)      all time-step inputs, row t*B+b == (t, b)
    h0/c0   : (B, H)        initial hidden / cell state (get_h0 -> zeros)
    wih     : (D, 4H)       = weight_ih_l0.T   (gate order i, f, g, o)
    whh     : (H, 4H)       = weight_hh_l0.T
    b       : (1, 4H)       = bias_ih_l0 + bias_hh_l0
    wq      : (H, A_PAD)    = q_function.weight.T zero-padded to 128 lanes
    bq      : (1, A_PAD)    = q_function.bias zero-padded to 128 lanes
    q_ref   : (T*B, A_PAD)  Q values for all time steps (lane-dense)
    hN/cN   : (B, H)        final hidden / cell state
    """
    TB, _ = x_ref.shape
    B, H = h0_ref.shape
    T = TB // B

    # ---- Batched input projection + combined bias for all timesteps:
    #      one MXU push with M = T*B.
    gx = (jnp.dot(x_ref[...], wih_ref[...],
                  preferred_element_type=jnp.float32)
          + b_ref[...])                                   # (T*B, 4H)

    # Pre-slice per-step (B, 4H) blocks in the prologue so their sublane
    # relayout work is off the serial recurrence chain.
    gx_t = [gx[t * B:(t + 1) * B, :] for t in range(T)]

    whh = whh_ref[...]                                    # load once
    h = h0_ref[...]                                       # carry in vregs
    c = c0_ref[...]

    feats = []
    # ---- Sequential recurrence, statically unrolled (T is a compile-time
    #      constant; equivalent to lax.fori_loop(..., unroll=True)).
    for t in range(T):
        gates = gx_t[t] + jnp.dot(h, whh,
                                  preferred_element_type=jnp.float32)  # (B,4H)

        # One full-vreg sigmoid + one full-vreg tanh over the whole 4H=128
        # lane tile; i/f/g/o are lane slices of those two results.
        sig = jax.nn.sigmoid(gates)
        tah = jnp.tanh(gates)
        i_g = sig[:, 0 * H:1 * H]
        f_g = sig[:, 1 * H:2 * H]
        g_g = tah[:, 2 * H:3 * H]
        o_g = sig[:, 3 * H:4 * H]

        c = f_g * c + i_g * g_g
        h = o_g * jnp.tanh(c)
        feats.append(h)                                   # stays vreg-resident

    # ---- Batched Q head: stack all hidden features (T*B x H ~= 2 vregs),
    #      single MXU push, single lane-dense (width 128) writeback.
    feats_all = jnp.concatenate(feats, axis=0)            # (T*B, H)
    q_ref[...] = (jnp.dot(feats_all, wq_ref[...],
                          preferred_element_type=jnp.float32)
                  + bq_ref[...])

    hN_ref[...] = h
    cN_ref[...] = c


@jax.jit
def lstm_net_forward(obs, h0, c0, w_ih, w_hh, b_ih, b_hh, w_q, b_q):
    T, B, D = obs.shape
    H = h0.shape[-1]
    A = w_q.shape[0]

    # Layout plumbing outside the kernel (free XLA ops on HBM arrays).
    x2d = obs.reshape(T * B, D)
    wih_t = jnp.transpose(w_ih)                 # (D, 4H)
    whh_t = jnp.transpose(w_hh)                 # (H, 4H)
    b_comb = (b_ih + b_hh).reshape(1, 4 * H)    # (1, 4H)

    # Lane-dense Q head: zero-pad the output dim to 128 so the kernel writes
    # full unmasked lanes; slice back to A afterwards.
    wq_t = jnp.zeros((H, A_PAD), jnp.float32).at[:, :A].set(jnp.transpose(w_q))
    bq_pad = jnp.zeros((1, A_PAD), jnp.float32).at[:, :A].set(b_q.reshape(1, A))

    vmem_spec = pl.BlockSpec(memory_space=pltpu.MemorySpace.VMEM)

    q_pad, h_n, c_n = pl.pallas_call(
        lstm_qnet_kernel,
        out_shape=(
            jax.ShapeDtypeStruct((T * B, A_PAD), jnp.float32),
            jax.ShapeDtypeStruct((B, H), jnp.float32),
            jax.ShapeDtypeStruct((B, H), jnp.float32),
        ),
        in_specs=[vmem_spec] * 8,
        out_specs=(vmem_spec, vmem_spec, vmem_spec),
    )(x2d, h0[0], c0[0], wih_t, whh_t, b_comb, wq_t, bq_pad)

    q = q_pad[:, :A].reshape(T, B, A)
    return q, (h_n[None], c_n[None])


def lstm_net_reference(obs, h0, c0, w_ih, w_hh, b_ih, b_hh, w_q, b_q):
    """Pure-JAX reference replicating torch.nn.LSTM (1 layer) + Linear."""
    H = h0.shape[-1]

    def step(carry, x_t):
        h, c = carry
        gates = x_t @ w_ih.T + b_ih + h @ w_hh.T + b_hh
        i_g = jax.nn.sigmoid(gates[:, 0 * H:1 * H])
        f_g = jax.nn.sigmoid(gates[:, 1 * H:2 * H])
        g_g = jnp.tanh(gates[:, 2 * H:3 * H])
        o_g = jax.nn.sigmoid(gates[:, 3 * H:4 * H])
        c_new = f_g * c + i_g * g_g
        h_new = o_g * jnp.tanh(c_new)
        return (h_new, c_new), h_new

    (h_n, c_n), feats = lax.scan(step, (h0[0], c0[0]), obs)
    q = feats @ w_q.T + b_q
    return q, (h_n[None], c_n[None])


if __name__ == "__main__":
    # Shapes implied by the module:
    #   observation_space.shape == (D,) -> vector obs, no conv
    #   hidden_size = 32, hidden_layers = 1, action_space.n = 4
    T, B, D, H, A = 8, 2, 16, 32, 4

    key = jax.random.PRNGKey(0)
    keys = jax.random.split(key, 8)
    k_lstm = 1.0 / jnp.sqrt(H)      # PyTorch nn.LSTM init bound
    k_lin = 1.0 / jnp.sqrt(H)       # PyTorch nn.Linear(H, A) init bound

    w_ih = jax.random.uniform(keys[0], (4 * H, D), jnp.float32, -k_lstm, k_lstm)
    w_hh = jax.random.uniform(keys[1], (4 * H, H), jnp.float32, -k_lstm, k_lstm)
    b_ih = jax.random.uniform(keys[2], (4 * H,), jnp.float32, -k_lstm, k_lstm)
    b_hh = jax.random.uniform(keys[3], (4 * H,), jnp.float32, -k_lstm, k_lstm)
    w_q = jax.random.uniform(keys[4], (A, H), jnp.float32, -k_lin, k_lin)
    b_q = jax.random.uniform(keys[5], (A,), jnp.float32, -k_lin, k_lin)

    obs = jax.random.normal(keys[6], (T, B, D), jnp.float32)
    # hidden=None path -> get_h0: zeros of shape (hidden_layers, B, H)
    h0 = jnp.zeros((1, B, H), jnp.float32)
    c0 = jnp.zeros((1, B, H), jnp.float32)

    q, (h_n, c_n) = lstm_net_forward(obs, h0, c0, w_ih, w_hh, b_ih, b_hh,
                                     w_q, b_q)
    jax.block_until_ready((q, h_n, c_n))

    q_ref, (h_ref, c_ref) = lstm_net_reference(
        obs, h0, c0, w_ih, w_hh, b_ih, b_hh, w_q, b_q)

    assert q.shape == (T, B, A) and h_n.shape == (1, B, H) and c_n.shape == (1, B, H)
    assert jnp.allclose(q, q_ref, atol=1e-5, rtol=1e-5)
    assert jnp.allclose(h_n, h_ref, atol=1e-5, rtol=1e-5)
    assert jnp.allclose(c_n, c_ref, atol=1e-5, rtol=1e-5)

    print("KERNEL_OK")
</pallas_src>

<mosaic_0001>
module attributes {stable_mosaic.version = 11 : i64} {
  func.func @lstm_qnet_kernel(%arg0: memref<16x16xf32, #tpu.memory_space<vmem>>, %arg1: memref<2x32xf32, #tpu.memory_space<vmem>>, %arg2: memref<2x32xf32, #tpu.memory_space<vmem>>, %arg3: memref<16x128xf32, #tpu.memory_space<vmem>>, %arg4: memref<32x128xf32, #tpu.memory_space<vmem>>, %arg5: memref<1x128xf32, #tpu.memory_space<vmem>>, %arg6: memref<32x128xf32, #tpu.memory_space<vmem>>, %arg7: memref<1x128xf32, #tpu.memory_space<vmem>>, %arg8: memref<16x128xf32, #tpu.memory_space<vmem>>, %arg9: memref<2x32xf32, #tpu.memory_space<vmem>>, %arg10: memref<2x32xf32, #tpu.memory_space<vmem>>) attributes {dimension_semantics = [], scalar_prefetch = 0 : i64, scratch_operands = 0 : i64, tpu.core_type = #tpu.core_type<tc>} {
    %c0 = arith.constant 0 : index
    %c0_0 = arith.constant 0 : index
    %0 = vector.load %arg0[%c0, %c0_0] : memref<16x16xf32, #tpu.memory_space<vmem>>, vector<16x16xf32>
    %c0_1 = arith.constant 0 : index
    %c0_2 = arith.constant 0 : index
    %1 = vector.load %arg3[%c0_1, %c0_2] : memref<16x128xf32, #tpu.memory_space<vmem>>, vector<16x128xf32>
    %cst = arith.constant dense<0.000000e+00> : vector<16x128xf32>
    %2 = tpu.matmul %0, %1, %cst {dimension_numbers = #tpu.dot_dimension_numbers<[1], [0], [0], [1], [0, 0, 1, 1], [], []>} : vector<16x16xf32>, vector<16x128xf32>, vector<16x128xf32> -> vector<16x128xf32>
    %c0_3 = arith.constant 0 : index
    %c0_4 = arith.constant 0 : index
    %3 = vector.load %arg5[%c0_3, %c0_4] : memref<1x128xf32, #tpu.memory_space<vmem>>, vector<1x128xf32>
    %4 = vector.broadcast %3 : vector<1x128xf32> to vector<16x128xf32>
    %5 = arith.addf %2, %4 : vector<16x128xf32>
    %6 = vector.extract_strided_slice %5 {offsets = [0, 0], sizes = [2, 128], strides = [1, 1]} : vector<16x128xf32> to vector<2x128xf32>
    %7 = vector.extract_strided_slice %5 {offsets = [2, 0], sizes = [2, 128], strides = [1, 1]} : vector<16x128xf32> to vector<2x128xf32>
    %8 = vector.extract_strided_slice %5 {offsets = [4, 0], sizes = [2, 128], strides = [1, 1]} : vector<16x128xf32> to vector<2x128xf32>
    %9 = vector.extract_strided_slice %5 {offsets = [6, 0], sizes = [2, 128], strides = [1, 1]} : vector<16x128xf32> to vector<2x128xf32>
    %10 = vector.extract_strided_slice %5 {offsets = [8, 0], sizes = [2, 128], strides = [1, 1]} : vector<16x128xf32> to vector<2x128xf32>
    %11 = vector.extract_strided_slice %5 {offsets = [10, 0], sizes = [2, 128], strides = [1, 1]} : vector<16x128xf32> to vector<2x128xf32>
    %12 = vector.extract_strided_slice %5 {offsets = [12, 0], sizes = [2, 128], strides = [1, 1]} : vector<16x128xf32> to vector<2x128xf32>
    %13 = vector.extract_strided_slice %5 {offsets = [14, 0], sizes = [2, 128], strides = [1, 1]} : vector<16x128xf32> to vector<2x128xf32>
    %c0_5 = arith.constant 0 : index
    %c0_6 = arith.constant 0 : index
    %14 = vector.load %arg4[%c0_5, %c0_6] : memref<32x128xf32, #tpu.memory_space<vmem>>, vector<32x128xf32>
    %c0_7 = arith.constant 0 : index
    %c0_8 = arith.constant 0 : index
    %15 = vector.load %arg1[%c0_7, %c0_8] : memref<2x32xf32, #tpu.memory_space<vmem>>, vector<2x32xf32>
    %c0_9 = arith.constant 0 : index
    %c0_10 = arith.constant 0 : index
    %16 = vector.load %arg2[%c0_9, %c0_10] : memref<2x32xf32, #tpu.memory_space<vmem>>, vector<2x32xf32>
    %cst_11 = arith.constant dense<0.000000e+00> : vector<2x128xf32>
    %17 = tpu.matmul %15, %14, %cst_11 {dimension_numbers = #tpu.dot_dimension_numbers<[1], [0], [0], [1], [0, 0, 1, 1], [], []>} : vector<2x32xf32>, vector<32x128xf32>, vector<2x128xf32> -> vector<2x128xf32>
    %18 = arith.addf %6, %17 : vector<2x128xf32>
    %19 = arith.negf %18 : vector<2x128xf32>
    %20 = math.exp %19 : vector<2x128xf32>
    %cst_12 = arith.constant 1.000000e+00 : f32
    %21 = vector.broadcast %cst_12 : f32 to vector<2x128xf32>
    %22 = arith.addf %21, %20 : vector<2x128xf32>
    %23 = arith.divf %21, %22 : vector<2x128xf32>
    %24 = math.tanh %18 : vector<2x128xf32>
    %25 = vector.extract_strided_slice %23 {offsets = [0, 0], sizes = [2, 32], strides = [1, 1]} : vector<2x128xf32> to vector<2x32xf32>
    %26 = vector.extract_strided_slice %23 {offsets = [0, 32], sizes = [2, 32], strides = [1, 1]} : vector<2x128xf32> to vector<2x32xf32>
    %27 = vector.extract_strided_slice %24 {offsets = [0, 64], sizes = [2, 32], strides = [1, 1]} : vector<2x128xf32> to vector<2x32xf32>
    %28 = vector.extract_strided_slice %23 {offsets = [0, 96], sizes = [2, 32], strides = [1, 1]} : vector<2x128xf32> to vector<2x32xf32>
    %29 = arith.mulf %26, %16 : vector<2x32xf32>
    %30 = arith.mulf %25, %27 : vector<2x32xf32>
    %31 = arith.addf %29, %30 : vector<2x32xf32>
    %32 = math.tanh %31 : vector<2x32xf32>
    %33 = arith.mulf %28, %32 : vector<2x32xf32>
    %cst_13 = arith.constant dense<0.000000e+00> : vector<2x128xf32>
    %34 = tpu.matmul %33, %14, %cst_13 {dimension_numbers = #tpu.dot_dimension_numbers<[1], [0], [0], [1], [0, 0, 1, 1], [], []>} : vector<2x32xf32>, vector<32x128xf32>, vector<2x128xf32> -> vector<2x128xf32>
    %35 = arith.addf %7, %34 : vector<2x128xf32>
    %36 = arith.negf %35 : vector<2x128xf32>
    %37 = math.exp %36 : vector<2x128xf32>
    %cst_14 = arith.constant 1.000000e+00 : f32
    %38 = vector.broadcast %cst_14 : f32 to vector<2x128xf32>
    %39 = arith.addf %38, %37 : vector<2x128xf32>
    %40 = arith.divf %38, %39 : vector<2x128xf32>
    %41 = math.tanh %35 : vector<2x128xf32>
    %42 = vector.extract_strided_slice %40 {offsets = [0, 0], sizes = [2, 32], strides = [1, 1]} : vector<2x128xf32> to vector<2x32xf32>
    %43 = vector.extract_strided_slice %40 {offsets = [0, 32], sizes = [2, 32], strides = [1, 1]} : vector<2x128xf32> to vector<2x32xf32>
    %44 = vector.extract_strided_slice %41 {offsets = [0, 64], sizes = [2, 32], strides = [1, 1]} : vector<2x128xf32> to vector<2x32xf32>
    %45 = vector.extract_strided_slice %40 {offsets = [0, 96], sizes = [2, 32], strides = [1, 1]} : vector<2x128xf32> to vector<2x32xf32>
    %46 = arith.mulf %43, %31 : vector<2x32xf32>
    %47 = arith.mulf %42, %44 : vector<2x32xf32>
    %48 = arith.addf %46, %47 : vector<2x32xf32>
    %49 = math.tanh %48 : vector<2x32xf32>
    %50 = arith.mulf %45, %49 : vector<2x32xf32>
    %cst_15 = arith.constant dense<0.000000e+00> : vector<2x128xf32>
    %51 = tpu.matmul %50, %14, %cst_15 {dimension_numbers = #tpu.dot_dimension_numbers<[1], [0], [0], [1], [0, 0, 1, 1], [], []>} : vector<2x32xf32>, vector<32x128xf32>, vector<2x128xf32> -> vector<2x128xf32>
    %52 = arith.addf %8, %51 : vector<2x128xf32>
    %53 = arith.negf %52 : vector<2x128xf32>
    %54 = math.exp %53 : vector<2x128xf32>
    %cst_16 = arith.constant 1.000000e+00 : f32
    %55 = vector.broadcast %cst_16 : f32 to vector<2x128xf32>
    %56 = arith.addf %55, %54 : vector<2x128xf32>
    %57 = arith.divf %55, %56 : vector<2x128xf32>
    %58 = math.tanh %52 : vector<2x128xf32>
    %59 = vector.extract_strided_slice %57 {offsets = [0, 0], sizes = [2, 32], strides = [1, 1]} : vector<2x128xf32> to vector<2x32xf32>
    %60 = vector.extract_strided_slice %57 {offsets = [0, 32], sizes = [2, 32], strides = [1, 1]} : vector<2x128xf32> to vector<2x32xf32>
    %61 = vector.extract_strided_slice %58 {offsets = [0, 64], sizes = [2, 32], strides = [1, 1]} : vector<2x128xf32> to vector<2x32xf32>
    %62 = vector.extract_strided_slice %57 {offsets = [0, 96], sizes = [2, 32], strides = [1, 1]} : vector<2x128xf32> to vector<2x32xf32>
    %63 = arith.mulf %60, %48 : vector<2x32xf32>
    %64 = arith.mulf %59, %61 : vector<2x32xf32>
    %65 = arith.addf %63, %64 : vector<2x32xf32>
    %66 = math.tanh %65 : vector<2x32xf32>
    %67 = arith.mulf %62, %66 : vector<2x32xf32>
    %cst_17 = arith.constant dense<0.000000e+00> : vector<2x128xf32>
    %68 = tpu.matmul %67, %14, %cst_17 {dimension_numbers = #tpu.dot_dimension_numbers<[1], [0], [0], [1], [0, 0, 1, 1], [], []>} : vector<2x32xf32>, vector<32x128xf32>, vector<2x128xf32> -> vector<2x128xf32>
    %69 = arith.addf %9, %68 : vector<2x128xf32>
    %70 = arith.negf %69 : vector<2x128xf32>
    %71 = math.exp %70 : vector<2x128xf32>
    %cst_18 = arith.constant 1.000000e+00 : f32
    %72 = vector.broadcast %cst_18 : f32 to vector<2x128xf32>
    %73 = arith.addf %72, %71 : vector<2x128xf32>
    %74 = arith.divf %72, %73 : vector<2x128xf32>
    %75 = math.tanh %69 : vector<2x128xf32>
    %76 = vector.extract_strided_slice %74 {offsets = [0, 0], sizes = [2, 32], strides = [1, 1]} : vector<2x128xf32> to vector<2x32xf32>
    %77 = vector.extract_strided_slice %74 {offsets = [0, 32], sizes = [2, 32], strides = [1, 1]} : vector<2x128xf32> to vector<2x32xf32>
    %78 = vector.extract_strided_slice %75 {offsets = [0, 64], sizes = [2, 32], strides = [1, 1]} : vector<2x128xf32> to vector<2x32xf32>
    %79 = vector.extract_strided_slice %74 {offsets = [0, 96], sizes = [2, 32], strides = [1, 1]} : vector<2x128xf32> to vector<2x32xf32>
    %80 = arith.mulf %77, %65 : vector<2x32xf32>
    %81 = arith.mulf %76, %78 : vector<2x32xf32>
    %82 = arith.addf %80, %81 : vector<2x32xf32>
    %83 = math.tanh %82 : vector<2x32xf32>
    %84 = arith.mulf %79, %83 : vector<2x32xf32>
    %cst_19 = arith.constant dense<0.000000e+00> : vector<2x128xf32>
    %85 = tpu.matmul %84, %14, %cst_19 {dimension_numbers = #tpu.dot_dimension_numbers<[1], [0], [0], [1], [0, 0, 1, 1], [], []>} : vector<2x32xf32>, vector<32x128xf32>, vector<2x128xf32> -> vector<2x128xf32>
    %86 = arith.addf %10, %85 : vector<2x128xf32>
    %87 = arith.negf %86 : vector<2x128xf32>
    %88 = math.exp %87 : vector<2x128xf32>
    %cst_20 = arith.constant 1.000000e+00 : f32
    %89 = vector.broadcast %cst_20 : f32 to vector<2x128xf32>
    %90 = arith.addf %89, %88 : vector<2x128xf32>
    %91 = arith.divf %89, %90 : vector<2x128xf32>
    %92 = math.tanh %86 : vector<2x128xf32>
    %93 = vector.extract_strided_slice %91 {offsets = [0, 0], sizes = [2, 32], strides = [1, 1]} : vector<2x128xf32> to vector<2x32xf32>
    %94 = vector.extract_strided_slice %91 {offsets = [0, 32], sizes = [2, 32], strides = [1, 1]} : vector<2x128xf32> to vector<2x32xf32>
    %95 = vector.extract_strided_slice %92 {offsets = [0, 64], sizes = [2, 32], strides = [1, 1]} : vector<2x128xf32> to vector<2x32xf32>
    %96 = vector.extract_strided_slice %91 {offsets = [0, 96], sizes = [2, 32], strides = [1, 1]} : vector<2x128xf32> to vector<2x32xf32>
    %97 = arith.mulf %94, %82 : vector<2x32xf32>
    %98 = arith.mulf %93, %95 : vector<2x32xf32>
    %99 = arith.addf %97, %98 : vector<2x32xf32>
    %100 = math.tanh %99 : vector<2x32xf32>
    %101 = arith.mulf %96, %100 : vector<2x32xf32>
    %cst_21 = arith.constant dense<0.000000e+00> : vector<2x128xf32>
    %102 = tpu.matmul %101, %14, %cst_21 {dimension_numbers = #tpu.dot_dimension_numbers<[1], [0], [0], [1], [0, 0, 1, 1], [], []>} : vector<2x32xf32>, vector<32x128xf32>, vector<2x128xf32> -> vector<2x128xf32>
    %103 = arith.addf %11, %102 : vector<2x128xf32>
    %104 = arith.negf %103 : vector<2x128xf32>
    %105 = math.exp %104 : vector<2x128xf32>
    %cst_22 = arith.constant 1.000000e+00 : f32
    %106 = vector.broadcast %cst_22 : f32 to vector<2x128xf32>
    %107 = arith.addf %106, %105 : vector<2x128xf32>
    %108 = arith.divf %106, %107 : vector<2x128xf32>
    %109 = math.tanh %103 : vector<2x128xf32>
    %110 = vector.extract_strided_slice %108 {offsets = [0, 0], sizes = [2, 32], strides = [1, 1]} : vector<2x128xf32> to vector<2x32xf32>
    %111 = vector.extract_strided_slice %108 {offsets = [0, 32], sizes = [2, 32], strides = [1, 1]} : vector<2x128xf32> to vector<2x32xf32>
    %112 = vector.extract_strided_slice %109 {offsets = [0, 64], sizes = [2, 32], strides = [1, 1]} : vector<2x128xf32> to vector<2x32xf32>
    %113 = vector.extract_strided_slice %108 {offsets = [0, 96], sizes = [2, 32], strides = [1, 1]} : vector<2x128xf32> to vector<2x32xf32>
    %114 = arith.mulf %111, %99 : vector<2x32xf32>
    %115 = arith.mulf %110, %112 : vector<2x32xf32>
    %116 = arith.addf %114, %115 : vector<2x32xf32>
    %117 = math.tanh %116 : vector<2x32xf32>
    %118 = arith.mulf %113, %117 : vector<2x32xf32>
    %cst_23 = arith.constant dense<0.000000e+00> : vector<2x128xf32>
    %119 = tpu.matmul %118, %14, %cst_23 {dimension_numbers = #tpu.dot_dimension_numbers<[1], [0], [0], [1], [0, 0, 1, 1], [], []>} : vector<2x32xf32>, vector<32x128xf32>, vector<2x128xf32> -> vector<2x128xf32>
    %120 = arith.addf %12, %119 : vector<2x128xf32>
    %121 = arith.negf %120 : vector<2x128xf32>
    %122 = math.exp %121 : vector<2x128xf32>
    %cst_24 = arith.constant 1.000000e+00 : f32
    %123 = vector.broadcast %cst_24 : f32 to vector<2x128xf32>
    %124 = arith.addf %123, %122 : vector<2x128xf32>
    %125 = arith.divf %123, %124 : vector<2x128xf32>
    %126 = math.tanh %120 : vector<2x128xf32>
    %127 = vector.extract_strided_slice %125 {offsets = [0, 0], sizes = [2, 32], strides = [1, 1]} : vector<2x128xf32> to vector<2x32xf32>
    %128 = vector.extract_strided_slice %125 {offsets = [0, 32], sizes = [2, 32], strides = [1, 1]} : vector<2x128xf32> to vector<2x32xf32>
    %129 = vector.extract_strided_slice %126 {offsets = [0, 64], sizes = [2, 32], strides = [1, 1]} : vector<2x128xf32> to vector<2x32xf32>
    %130 = vector.extract_strided_slice %125 {offsets = [0, 96], sizes = [2, 32], strides = [1, 1]} : vector<2x128xf32> to vector<2x32xf32>
    %131 = arith.mulf %128, %116 : vector<2x32xf32>
    %132 = arith.mulf %127, %129 : vector<2x32xf32>
    %133 = arith.addf %131, %132 : vector<2x32xf32>
    %134 = math.tanh %133 : vector<2x32xf32>
    %135 = arith.mulf %130, %134 : vector<2x32xf32>
    %cst_25 = arith.constant dense<0.000000e+00> : vector<2x128xf32>
    %136 = tpu.matmul %135, %14, %cst_25 {dimension_numbers = #tpu.dot_dimension_numbers<[1], [0], [0], [1], [0, 0, 1, 1], [], []>} : vector<2x32xf32>, vector<32x128xf32>, vector<2x128xf32> -> vector<2x128xf32>
    %137 = arith.addf %13, %136 : vector<2x128xf32>
    %138 = arith.negf %137 : vector<2x128xf32>
    %139 = math.exp %138 : vector<2x128xf32>
    %cst_26 = arith.constant 1.000000e+00 : f32
    %140 = vector.broadcast %cst_26 : f32 to vector<2x128xf32>
    %141 = arith.addf %140, %139 : vector<2x128xf32>
    %142 = arith.divf %140, %141 : vector<2x128xf32>
    %143 = math.tanh %137 : vector<2x128xf32>
    %144 = vector.extract_strided_slice %142 {offsets = [0, 0], sizes = [2, 32], strides = [1, 1]} : vector<2x128xf32> to vector<2x32xf32>
    %145 = vector.extract_strided_slice %142 {offsets = [0, 32], sizes = [2, 32], strides = [1, 1]} : vector<2x128xf32> to vector<2x32xf32>
    %146 = vector.extract_strided_slice %143 {offsets = [0, 64], sizes = [2, 32], strides = [1, 1]} : vector<2x128xf32> to vector<2x32xf32>
    %147 = vector.extract_strided_slice %142 {offsets = [0, 96], sizes = [2, 32], strides = [1, 1]} : vector<2x128xf32> to vector<2x32xf32>
    %148 = arith.mulf %145, %133 : vector<2x32xf32>
    %149 = arith.mulf %144, %146 : vector<2x32xf32>
    %150 = arith.addf %148, %149 : vector<2x32xf32>
    %151 = math.tanh %150 : vector<2x32xf32>
    %152 = arith.mulf %147, %151 : vector<2x32xf32>
    %153 = tpu.concatenate %33, %50, %67, %84, %101, %118, %135, %152 in 0 : vector<2x32xf32>, vector<2x32xf32>, vector<2x32xf32>, vector<2x32xf32>, vector<2x32xf32>, vector<2x32xf32>, vector<2x32xf32>, vector<2x32xf32> -> vector<16x32xf32>
    %c0_27 = arith.constant 0 : index
    %c0_28 = arith.constant 0 : index
    %154 = vector.load %arg6[%c0_27, %c0_28] : memref<32x128xf32, #tpu.memory_space<vmem>>, vector<32x128xf32>
    %cst_29 = arith.constant dense<0.000000e+00> : vector<16x128xf32>
    %155 = tpu.matmul %153, %154, %cst_29 {dimension_numbers = #tpu.dot_dimension_numbers<[1], [0], [0], [1], [0, 0, 1, 1], [], []>} : vector<16x32xf32>, vector<32x128xf32>, vector<16x128xf32> -> vector<16x128xf32>
    %c0_30 = arith.constant 0 : index
    %c0_31 = arith.constant 0 : index
    %156 = vector.load %arg7[%c0_30, %c0_31] : memref<1x128xf32, #tpu.memory_space<vmem>>, vector<1x128xf32>
    %157 = vector.broadcast %156 : vector<1x128xf32> to vector<16x128xf32>
    %158 = arith.addf %155, %157 : vector<16x128xf32>
    %c0_32 = arith.constant 0 : index
    %c0_33 = arith.constant 0 : index
    %159 = vector.load %arg8[%c0_32, %c0_33] : memref<16x128xf32, #tpu.memory_space<vmem>>, vector<16x128xf32>
    tpu.vector_store %arg8[%c0_32, %c0_33], %158 {strides = array<i32>} : memref<16x128xf32, #tpu.memory_space<vmem>>, vector<16x128xf32>,
    %c0_34 = arith.constant 0 : index
    %c0_35 = arith.constant 0 : index
    %160 = vector.load %arg9[%c0_34, %c0_35] : memref<2x32xf32, #tpu.memory_space<vmem>>, vector<2x32xf32>
    tpu.vector_store %arg9[%c0_34, %c0_35], %152 {strides = array<i32>} : memref<2x32xf32, #tpu.memory_space<vmem>>, vector<2x32xf32>,
    %c0_36 = arith.constant 0 : index
    %c0_37 = arith.constant 0 : index
    %161 = vector.load %arg10[%c0_36, %c0_37] : memref<2x32xf32, #tpu.memory_space<vmem>>, vector<2x32xf32>
    tpu.vector_store %arg10[%c0_36, %c0_37], %150 {strides = array<i32>} : memref<2x32xf32, #tpu.memory_space<vmem>>, vector<2x32xf32>,
    return
  }
}

</mosaic_0001>

<bundles_post_ra>
// kernel: lstm_net_forward.1
= control target key start
LH: loop header
LB: loop body
LE: loop exit
PB: predicated region body
PF: predicated region fallthrough
CT: control target
= control target key end

     0   :  { %16 = vsyncpa [#allocation3], 0  ;;  %vm42_vm0 = vcmask 130048   ;;  %s1114_s0 = inlined_call_operand.vmem [shape: f32[16,16], index: 0, kind: input, shape index: {}]   ;;  %s1115_s1 = inlined_call_operand.vmem [shape: f32[2,32], index: 1, kind: input, shape index: {}]   ;;  %s1116_s2 = inlined_call_operand.vmem [shape: f32[2,32], index: 2, kind: input, shape index: {}]   ;;  %s1117_s3 = inlined_call_operand.vmem [shape: f32[16,128], index: 3, kind: input, shape index: {}]   ;;  %s1118_s4 = inlined_call_operand.vmem [shape: f32[32,128], index: 4, kind: input, shape index: {}]   ;;  %s1119_s5 = inlined_call_operand.vmem [shape: f32[1,128], index: 5, kind: input, shape index: {}]   ;;  %s1120_s6 = inlined_call_operand.vmem [shape: f32[32,128], index: 6, kind: input, shape index: {}]   ;;  %s1121_s7 = inlined_call_operand.vmem [shape: f32[1,128], index: 7, kind: input, shape index: {}]   ;;  %s1122_s8 = inlined_call_operand.vmem [shape: f32[16,128], index: 8, kind: output, shape index: {0}]   ;;  %s1123_s9 = inlined_call_operand.hbm [shape: f32[2,32], index: 9, kind: output, shape index: {1}]   ;;  %s1124_s10 = inlined_call_operand.hbm [shape: f32[2,32], index: 10, kind: output, shape index: {2}]  }
   0x1   :  { %v934_v0 = vld [vmem:[%s1118_s4 + $0x18] sm:$0xff]  ;;  %v37_v1 = vld [vmem:[%s1117_s3 + $0x8] sm:$0xff]  ;;  %v942_v2 = vld [vmem:[%s1118_s4 + $0x10] sm:$0xff] }
   0x2   :  { %94 = vmatpush.msra.mxu1 %v934_v0  ;;  %63 = vmatpush.msra.mxu0 %v37_v1  ;;  %v36_v3 = vld [vmem:[%s1117_s3] sm:$0xff]  ;;  %v954_v5 = vld [vmem:[%s1118_s4 + $0x8] sm:$0xff] }
   0x3   :  { %v34_v4 = vld [vmem:[%s1114_s0] sm:$0xff]  ;;  %161 = vmatpush.msra.mxu3 %v934_v0  ;;  %371 = vmatpush.msra.mxu2 %v934_v0 }
   0x4   :  { %95 = vmatpush.msra.mxu1 %v942_v2  ;;  %64 = vmatpush.msra.mxu0 %v36_v3 }
   0x5   :  { %17 = vsyncpa [#allocation5], 0  ;;  %728 = vmatmul.msk.f32.vlgmr.msra.gmra.mxu0 %vm42_vm0, %v34_v4  ;;  %v963_v6 = vld [vmem:[%s1118_s4] sm:$0xff]  ;;  %162 = vmatpush.msra.mxu3 %v942_v2  ;;  %vm78_vm1 = vcmask 261120   ;;  %s871_s28 = smov 64   ;;  %s872_s11 = smov 32  }
   0x6   :  { %96 = vmatpush.msra.mxu1 %v954_v5  ;;  %v76_v7 = vld [vmem:[%s1115_s1] sm:$0x3]  ;;  %372 = vmatpush.msra.mxu2 %v942_v2  ;;  %vm629_vm14 = vcmask 1041408   ;;  %vm631_vm15 = vcmask 1043456   ;;  %s701_s25 = sshll.u32 %s1123_s9, 4  ;;  %s875_s26 = smov [#allocation4]   ;;  %s702_s25 = int_to_ptr.hbm [resolvable:$true] %s701_s25 }
   0x7   :  { %163 = vmatpush.msra.mxu3 %v954_v5  ;;  %507 = vmatpush.msrb.mxu0 %v934_v0  ;;  %v996_v8 = vld [vmem:[%s1119_s5] ss:$0 sm:$0xff]  ;;  %s710_s27 = sshll.u32 %s875_s26, 4  ;;  %s711_s27 = int_to_ptr.vmem [resolvable:$true] %s710_s27 }
   0x8   :  { %97 = vmatpush.msra.mxu1 %v963_v6  ;;  %373 = vmatpush.msra.mxu2 %v954_v5  ;;  %v77_v14 = vld [vmem:[%s1116_s2] sm:$0x3] }
   0x9   :  { %730 = vmatmul.msk.f32.vlgmr.msra.gmra.mxu1 %vm78_vm1, %v76_v7  ;;  %164 = vmatpush.msra.mxu3 %v963_v6 }
   0xa   :  { %301 = vmatpush.msrb.mxu1 %v934_v0  ;;  %374 = vmatpush.msra.mxu2 %v963_v6 }
   0xb   :  { %231 = vmatpush.msrb.mxu3 %v934_v0  ;;  %508 = vmatpush.msrb.mxu0 %v942_v2 }
   0xc   :  { %302 = vmatpush.msrb.mxu1 %v942_v2 }
   0xd   :  { %232 = vmatpush.msrb.mxu3 %v942_v2  ;;  %509 = vmatpush.msrb.mxu0 %v954_v5 }
   0xe   :  { %303 = vmatpush.msrb.mxu1 %v954_v5 }
   0xf   :  { %233 = vmatpush.msrb.mxu3 %v954_v5  ;;  %510 = vmatpush.msrb.mxu0 %v963_v6 }
  0x10   :  { %304 = vmatpush.msrb.mxu1 %v963_v6 }
  0x11   :  { %234 = vmatpush.msrb.mxu3 %v963_v6 }
  0x12   :  { %577 = vmatpush.msra.mxu1 %v934_v0 }
  0x14   :  { %578 = vmatpush.msra.mxu1 %v942_v2 }
  0x16   :  { %579 = vmatpush.msra.mxu1 %v954_v5 }
  0x18   :  { %580 = vmatpush.msra.mxu1 %v963_v6 }
  0x82   :  { %v66_v9 = vpop.f32.mrf.mxu0 }
  0x83   :  { %v999_v10 = vadd.f32 %v996_v8, %v66_v9 }
  0x86   :  { %v99_v11 = vpop.f32.mrf.mxu1 }
  0x87   :  { %v102_v12 = vadd.f32 %v99_v11, %v999_v10 }
  0x89   :  { %755 = vtanh.f32 %v102_v12  ;;  %v731_v15 = vmul.f32 -1.442695, %v102_v12 }
  0x8b   :  { %757 = vpow2.f32 %v731_v15 }
  0x8f   :  { %v756_v13 = vpop.eup %755 }
  0x90   :  { %129 = vrot.lane.b32.xlu0 %v756_v13, %s871_s28 }
  0x91   :  { %v758_v16 = vpop.eup %757 }
  0x92   :  { %v106_v17 = vadd.f32 1.0, %v758_v16 }
  0x94   :  { %759 = vrcp.f32 %v106_v17  ;;  %v118_v23 = vand.u32 2147483648, %v106_v17  ;;  %vm112_vm3 = vweird.f32 %v106_v17  ;;  %v116_v24 = vand.u32 2147483647, %v106_v17 }
  0x96   :  { %v119_v26 = vor.u32 1.1754944e-38, %v118_v23  ;;  %vm117_vm5 = vcmp.eq.f32.partialorder %v116_v24, 8.507059e+37 }
  0x98   :  { %124 = vrot.lane.b32.xlu0 %v77_v14, %s872_s11 }
  0x9a   :  { %v760_v18 = vpop.eup %759 }
  0x9b   :  { %v108_v19 = vmul.f32 %v760_v18, %v106_v17  ;;  %vm113_vm2 = vweird.f32 %v760_v18 }
  0x9c   :  { %vm114_vm4 = vmor %vm112_vm3, %vm113_vm2 }
  0x9d   :  { %v109_v20 = vsub.f32 1.0, %v108_v19 }
  0x9f   :  { %v110_v21 = vmul.f32 %v760_v18, %v109_v20 }
  0xa1   :  { %v111_v22 = vadd.f32 %v760_v18, %v110_v21 }
  0xa3   :  { %v115_v25 = vsel %vm114_vm4, %v760_v18, %v111_v22 }
  0xa4   :  { %v120_v28 = vsel %vm117_vm5, %v119_v26, %v115_v25 }
 0x102   :  { %v130_v27 = vpop.permute.xlu0 %129 }
 0x103   :  { %v132_v29 = vmul.f32 %v130_v27, %v120_v28 }
 0x105   :  { %134 = vrot.lane.b32.xlu1 %v132_v29, %s872_s11 }
 0x10a   :  { %v125_v30 = vpop.permute.xlu0 %124 }
 0x10b   :  { %v127_v31 = vmul.f32 %v125_v30, %v120_v28 }
 0x177   :  { %v135_v32 = vpop.permute.xlu1 %134 }
 0x178   :  { %v137_v33 = vadd.f32 %v135_v32, %v127_v31 }
 0x17a   :  { %761 = vtanh.f32 %v137_v33  ;;  %v194_v57 = vrot.slane %v137_v33, 6 }
 0x180   :  { %v762_v34 = vpop.eup %761 }
 0x181   :  { %140 = vrot.lane.b32.xlu1 %v762_v34, %s871_s28 }
 0x1f3   :  { %v141_v35 = vpop.permute.xlu1 %140 }
 0x1f4   :  { %v1009_v36 = vmul.f32 %v141_v35, %v120_v28 }
 0x1f6   :  { %145 = vrot.lane.b32.xlu2 %v1009_v36, %s872_s11 }
 0x250   :  { %v146_v37 = vpop.permute.xlu2 %145 }
 0x251   :  { %732 = vmatmul.msk.f32.vlgmr.msra.gmra.mxu3 %vm78_vm1, %v146_v37 }
 0x252   :  { %437 = vmatpush.msra.mxu3 %v934_v0 }
 0x254   :  { %438 = vmatpush.msra.mxu3 %v942_v2 }
 0x256   :  { %439 = vmatpush.msra.mxu3 %v954_v5 }
 0x258   :  { %440 = vmatpush.msra.mxu3 %v963_v6 }
 0x2d4   :  { %v166_v38 = vpop.f32.mrf.mxu3 }
 0x2d5   :  { %v170_v39 = vrot.slane %v166_v38, 6 }
 0x2d7   :  { %v172_v40 = vadd.f32 %v170_v39, %v999_v10 }
 0x2d9   :  { %763 = vtanh.f32 %v172_v40  ;;  %v733_v42 = vmul.f32 -1.442695, %v172_v40 }
 0x2db   :  { %765 = vpow2.f32 %v733_v42 }
 0x2df   :  { %v764_v41 = vpop.eup %763 }
 0x2e0   :  { %198 = vrot.lane.b32.xlu2 %v764_v41, %s871_s28 }
 0x2e1   :  { %v766_v43 = vpop.eup %765 }
 0x2e2   :  { %v176_v44 = vadd.f32 1.0, %v766_v43 }
 0x2e4   :  { %767 = vrcp.f32 %v176_v44  ;;  %v188_v50 = vand.u32 2147483648, %v176_v44  ;;  %vm182_vm7 = vweird.f32 %v176_v44  ;;  %v186_v51 = vand.u32 2147483647, %v176_v44 }
 0x2e6   :  { %v189_v53 = vor.u32 1.1754944e-38, %v188_v50  ;;  %vm187_vm9 = vcmp.eq.f32.partialorder %v186_v51, 8.507059e+37 }
 0x2ea   :  { %v768_v45 = vpop.eup %767 }
 0x2eb   :  { %v178_v46 = vmul.f32 %v768_v45, %v176_v44  ;;  %vm183_vm6 = vweird.f32 %v768_v45 }
 0x2ec   :  { %vm184_vm8 = vmor %vm182_vm7, %vm183_vm6  ;;  %vm633_vm6 = vcmask 1045504  }
 0x2ed   :  { %v179_v47 = vsub.f32 1.0, %v178_v46 }
 0x2ef   :  { %v180_v48 = vmul.f32 %v768_v45, %v179_v47 }
 0x2f1   :  { %v181_v49 = vadd.f32 %v768_v45, %v180_v48 }
 0x2f3   :  { %v185_v52 = vsel %vm184_vm8, %v768_v45, %v181_v49 }
 0x2f4   :  { %v190_v55 = vsel %vm187_vm9, %v189_v53, %v185_v52 }
 0x2f5   :  { %v196_v58 = vmul.f32 %v194_v57, %v190_v55 }
 0x33a   :  { %v199_v54 = vpop.permute.xlu2 %198 }
 0x33b   :  { %v201_v56 = vmul.f32 %v199_v54, %v190_v55 }
 0x33d   :  { %203 = vrot.lane.b32.xlu0 %v201_v56, %s872_s11 }
 0x3af   :  { %v204_v59 = vpop.permute.xlu0 %203 }
 0x3b0   :  { %v206_v60 = vadd.f32 %v204_v59, %v196_v58 }
 0x3b2   :  { %769 = vtanh.f32 %v206_v60  ;;  %v264_v23 = vrot.slane %v206_v60, 6 }
 0x3b8   :  { %v770_v61 = vpop.eup %769 }
 0x3b9   :  { %209 = vrot.lane.b32.xlu1 %v770_v61, %s871_s28  ;;  %v35_v61 = vld [vmem:[%s1114_s0 + $0x8] sm:$0xff] }
 0x3ba   :  { %729 = vmatmul.msk.f32.gmra.mxu0 %vm42_vm0, %v35_v61 }
 0x42b   :  { %v210_v62 = vpop.permute.xlu1 %209 }
 0x42c   :  { %v212_v63 = vmul.f32 %v210_v62, %v190_v55 }
 0x42e   :  { %v214_v0 = vrot.slane %v212_v63, 2  ;;  %v630_v30 = vsel %vm629_vm14, %v1009_v36, %v212_v63 }
 0x430   :  { %215 = vrot.lane.b32.xlu2 %v214_v0, %s872_s11 }
 0x437   :  { %v69_v63 = vpop.f32.mrf.mxu0 }
 0x438   :  { %v1047_v0 = vadd.f32 %v996_v8, %v69_v63 }
 0x48a   :  { %v216_v1 = vpop.permute.xlu2 %215 }
 0x48b   :  { %734 = vmatmul.msk.f32.vlgmr.msrb.gmra.mxu3 %vm78_vm1, %v216_v1 }
 0x50e   :  { %v236_v2 = vpop.f32.mrf.mxu3 }
 0x50f   :  { %v240_v3 = vrot.slane %v236_v2, 4 }
 0x511   :  { %v242_v4 = vadd.f32 %v240_v3, %v999_v10 }
 0x513   :  { %771 = vtanh.f32 %v242_v4  ;;  %v735_v6 = vmul.f32 -1.442695, %v242_v4 }
 0x515   :  { %773 = vpow2.f32 %v735_v6 }
 0x519   :  { %v772_v5 = vpop.eup %771 }
 0x51a   :  { %268 = vrot.lane.b32.xlu0 %v772_v5, %s871_s28 }
 0x51b   :  { %v774_v7 = vpop.eup %773 }
 0x51c   :  { %v246_v9 = vadd.f32 1.0, %v774_v7 }
 0x51e   :  { %775 = vrcp.f32 %v246_v9  ;;  %v258_v16 = vand.u32 2147483648, %v246_v9  ;;  %vm252_vm11 = vweird.f32 %v246_v9  ;;  %v256_v17 = vand.u32 2147483647, %v246_v9 }
 0x520   :  { %v259_v19 = vor.u32 1.1754944e-38, %v258_v16  ;;  %vm257_vm13 = vcmp.eq.f32.partialorder %v256_v17, 8.507059e+37 }
 0x524   :  { %v776_v11 = vpop.eup %775 }
 0x525   :  { %v248_v12 = vmul.f32 %v776_v11, %v246_v9  ;;  %vm253_vm10 = vweird.f32 %v776_v11 }
 0x526   :  { %vm254_vm12 = vmor %vm252_vm11, %vm253_vm10 }
 0x527   :  { %v249_v13 = vsub.f32 1.0, %v248_v12 }
 0x529   :  { %v250_v14 = vmul.f32 %v776_v11, %v249_v13 }
 0x52b   :  { %v251_v15 = vadd.f32 %v776_v11, %v250_v14 }
 0x52d   :  { %v255_v18 = vsel %vm254_vm12, %v776_v11, %v251_v15 }
 0x52e   :  { %v260_v21 = vsel %vm257_vm13, %v259_v19, %v255_v18 }
 0x52f   :  { %v266_v24 = vmul.f32 %v264_v23, %v260_v21 }
 0x58c   :  { %v269_v20 = vpop.permute.xlu0 %268 }
 0x58d   :  { %v271_v22 = vmul.f32 %v269_v20, %v260_v21 }
 0x58f   :  { %273 = vrot.lane.b32.xlu1 %v271_v22, %s872_s11 }
 0x601   :  { %v274_v25 = vpop.permute.xlu1 %273 }
 0x602   :  { %v276_v26 = vadd.f32 %v274_v25, %v266_v24 }
 0x604   :  { %777 = vtanh.f32 %v276_v26  ;;  %v334_v52 = vrot.slane %v276_v26, 6 }
 0x60a   :  { %v778_v27 = vpop.eup %777 }
 0x60b   :  { %279 = vrot.lane.b32.xlu2 %v778_v27, %s871_s28 }
 0x665   :  { %v280_v28 = vpop.permute.xlu2 %279 }
 0x666   :  { %v282_v29 = vmul.f32 %v280_v28, %v260_v21 }
 0x668   :  { %v284_v31 = vrot.slane %v282_v29, 4  ;;  %v632_v32 = vsel %vm631_vm15, %v630_v30, %v282_v29 }
 0x66a   :  { %285 = vrot.lane.b32.xlu0 %v284_v31, %s872_s11 }
 0x6dc   :  { %v286_v33 = vpop.permute.xlu0 %285 }
 0x6dd   :  { %736 = vmatmul.msk.f32.vlgmr.msrb.gmra.mxu1 %vm78_vm1, %v286_v33 }
 0x75a   :  { %v306_v34 = vpop.f32.mrf.mxu1 }
 0x75b   :  { %v310_v35 = vrot.slane %v306_v34, 2 }
 0x75d   :  { %v312_v37 = vadd.f32 %v310_v35, %v999_v10 }
 0x75f   :  { %779 = vtanh.f32 %v312_v37  ;;  %v737_v39 = vmul.f32 -1.442695, %v312_v37 }
 0x761   :  { %781 = vpow2.f32 %v737_v39 }
 0x765   :  { %v780_v38 = vpop.eup %779 }
 0x766   :  { %338 = vrot.lane.b32.xlu1 %v780_v38, %s871_s28 }
 0x767   :  { %v782_v40 = vpop.eup %781 }
 0x768   :  { %v316_v36 = vadd.f32 1.0, %v782_v40 }
 0x76a   :  { %783 = vrcp.f32 %v316_v36  ;;  %v328_v46 = vand.u32 2147483648, %v316_v36  ;;  %vm322_vm3 = vweird.f32 %v316_v36  ;;  %v326_v47 = vand.u32 2147483647, %v316_v36 }
 0x76c   :  { %v329_v48 = vor.u32 1.1754944e-38, %v328_v46  ;;  %vm327_vm5 = vcmp.eq.f32.partialorder %v326_v47, 8.507059e+37 }
 0x770   :  { %v784_v41 = vpop.eup %783 }
 0x771   :  { %v318_v42 = vmul.f32 %v784_v41, %v316_v36  ;;  %vm323_vm2 = vweird.f32 %v784_v41 }
 0x772   :  { %vm324_vm4 = vmor %vm322_vm3, %vm323_vm2 }
 0x773   :  { %v319_v43 = vsub.f32 1.0, %v318_v42 }
 0x775   :  { %v320_v44 = vmul.f32 %v784_v41, %v319_v43 }
 0x777   :  { %v321_v45 = vadd.f32 %v784_v41, %v320_v44 }
 0x779   :  { %v325_v10 = vsel %vm324_vm4, %v784_v41, %v321_v45 }
 0x77a   :  { %v330_v50 = vsel %vm327_vm5, %v329_v48, %v325_v10 }
 0x77b   :  { %v336_v53 = vmul.f32 %v334_v52, %v330_v50 }
 0x7d8   :  { %v339_v49 = vpop.permute.xlu1 %338 }
 0x7d9   :  { %v341_v51 = vmul.f32 %v339_v49, %v330_v50 }
 0x7db   :  { %343 = vrot.lane.b32.xlu2 %v341_v51, %s872_s11 }
 0x835   :  { %v344_v54 = vpop.permute.xlu2 %343 }
 0x836   :  { %v346_v55 = vadd.f32 %v344_v54, %v336_v53 }
 0x838   :  { %785 = vtanh.f32 %v346_v55  ;;  %v401_v20 = vrot.slane %v346_v55, 6 }
 0x83e   :  { %v786_v56 = vpop.eup %785 }
 0x83f   :  { %349 = vrot.lane.b32.xlu0 %v786_v56, %s871_s28 }
 0x8b1   :  { %v350_v57 = vpop.permute.xlu0 %349 }
 0x8b2   :  { %v352_v58 = vmul.f32 %v350_v57, %v330_v50 }
 0x8b4   :  { %v354_v59 = vrot.slane %v352_v58, 6  ;;  %v1038_v60 = vsel %vm633_vm6, %v632_v32, %v352_v58 }
 0x8b6   :  { %355 = vrot.lane.b32.xlu1 %v354_v59, %s872_s11 }
 0x928   :  { %v356_v62 = vpop.permute.xlu1 %355 }
 0x929   :  { %738 = vmatmul.msk.f32.vlgmr.msra.gmra.mxu2 %vm78_vm1, %v356_v62 }
 0x9ac   :  { %v376_v1 = vpop.f32.mrf.mxu2 }
 0x9ad   :  { %v379_v2 = vadd.f32 %v376_v1, %v1047_v0 }
 0x9af   :  { %787 = vtanh.f32 %v379_v2  ;;  %v739_v4 = vmul.f32 -1.442695, %v379_v2 }
 0x9b1   :  { %789 = vpow2.f32 %v739_v4 }
 0x9b5   :  { %v788_v3 = vpop.eup %787 }
 0x9b6   :  { %405 = vrot.lane.b32.xlu2 %v788_v3, %s871_s28 }
 0x9b7   :  { %v790_v5 = vpop.eup %789 }
 0x9b8   :  { %v383_v6 = vadd.f32 1.0, %v790_v5 }
 0x9ba   :  { %791 = vrcp.f32 %v383_v6  ;;  %v395_v8 = vand.u32 2147483648, %v383_v6  ;;  %vm389_vm7 = vweird.f32 %v383_v6  ;;  %v393_v14 = vand.u32 2147483647, %v383_v6 }
 0x9bc   :  { %v396_v16 = vor.u32 1.1754944e-38, %v395_v8  ;;  %vm394_vm9 = vcmp.eq.f32.partialorder %v393_v14, 8.507059e+37 }
 0x9c0   :  { %v792_v7 = vpop.eup %791 }
 0x9c1   :  { %v385_v9 = vmul.f32 %v792_v7, %v383_v6  ;;  %vm390_vm0 = vweird.f32 %v792_v7 }
 0x9c2   :  { %vm391_vm8 = vmor %vm389_vm7, %vm390_vm0 }
 0x9c3   :  { %v386_v11 = vsub.f32 1.0, %v385_v9 }
 0x9c5   :  { %v387_v12 = vmul.f32 %v792_v7, %v386_v11 }
 0x9c7   :  { %v388_v13 = vadd.f32 %v792_v7, %v387_v12 }
 0x9c9   :  { %v392_v15 = vsel %vm391_vm8, %v792_v7, %v388_v13  ;;  %vm685_vm8 = vcmask 261126  }
 0x9ca   :  { %v397_v18 = vsel %vm394_vm9, %v396_v16, %v392_v15 }
 0x9cb   :  { %v403_v21 = vmul.f32 %v401_v20, %v397_v18 }
 0xa10   :  { %v406_v17 = vpop.permute.xlu2 %405 }
 0xa11   :  { %v408_v19 = vmul.f32 %v406_v17, %v397_v18 }
 0xa13   :  { %410 = vrot.lane.b32.xlu0 %v408_v19, %s872_s11 }
 0xa85   :  { %v411_v22 = vpop.permute.xlu0 %410 }
 0xa86   :  { %v413_v23 = vadd.f32 %v411_v22, %v403_v21 }
 0xa88   :  { %793 = vtanh.f32 %v413_v23  ;;  %v470_v47 = vrot.slane %v413_v23, 6 }
 0xa8e   :  { %v794_v24 = vpop.eup %793 }
 0xa8f   :  { %416 = vrot.lane.b32.xlu1 %v794_v24, %s871_s28 }
 0xb01   :  { %v417_v25 = vpop.permute.xlu1 %416 }
 0xb02   :  { %v1053_v26 = vmul.f32 %v417_v25, %v397_v18 }
 0xb04   :  { %421 = vrot.lane.b32.xlu2 %v1053_v26, %s872_s11 }
 0xb5e   :  { %v422_v27 = vpop.permute.xlu2 %421 }
 0xb5f   :  { %740 = vmatmul.msk.f32.vlgmr.msra.gmra.mxu3 %vm78_vm1, %v422_v27 }
 0xbe2   :  { %v442_v28 = vpop.f32.mrf.mxu3 }
 0xbe3   :  { %v446_v29 = vrot.slane %v442_v28, 6 }
 0xbe5   :  { %v448_v30 = vadd.f32 %v446_v29, %v1047_v0 }
 0xbe7   :  { %795 = vtanh.f32 %v448_v30  ;;  %v741_v32 = vmul.f32 -1.442695, %v448_v30 }
 0xbe9   :  { %797 = vpow2.f32 %v741_v32  ;;  %v639_v32 = vld [vmem:[%s1120_s6 + $0x8] sm:$0xff] }
 0xbed   :  { %v796_v31 = vpop.eup %795 }
 0xbee   :  { %474 = vrot.lane.b32.xlu0 %v796_v31, %s871_s28  ;;  %v641_v31 = vld [vmem:[%s1120_s6 + $0x18] sm:$0xff] }
 0xbef   :  { %v798_v33 = vpop.eup %797  ;;  %668 = vmatpush.msrb.mxu2 %v641_v31 }
 0xbf0   :  { %v452_v34 = vadd.f32 1.0, %v798_v33 }
 0xbf2   :  { %799 = vrcp.f32 %v452_v34  ;;  %v464_v36 = vand.u32 2147483648, %v452_v34  ;;  %vm458_vm11 = vweird.f32 %v452_v34  ;;  %v462_v41 = vand.u32 2147483647, %v452_v34 }
 0xbf4   :  { %v465_v43 = vor.u32 1.1754944e-38, %v464_v36  ;;  %vm463_vm13 = vcmp.eq.f32.partialorder %v462_v41, 8.507059e+37 }
 0xbf8   :  { %v800_v35 = vpop.eup %799 }
 0xbf9   :  { %v454_v37 = vmul.f32 %v800_v35, %v452_v34  ;;  %vm459_vm10 = vweird.f32 %v800_v35 }
 0xbfa   :  { %vm460_vm12 = vmor %vm458_vm11, %vm459_vm10 }
 0xbfb   :  { %v455_v38 = vsub.f32 1.0, %v454_v37 }
 0xbfd   :  { %v456_v39 = vmul.f32 %v800_v35, %v455_v38 }
 0xbff   :  { %v457_v40 = vadd.f32 %v800_v35, %v456_v39 }
 0xc01   :  { %v461_v42 = vsel %vm460_vm12, %v800_v35, %v457_v40 }
 0xc02   :  { %v466_v45 = vsel %vm463_vm13, %v465_v43, %v461_v42 }
 0xc03   :  { %v472_v10 = vmul.f32 %v470_v47, %v466_v45 }
 0xc60   :  { %v475_v44 = vpop.permute.xlu0 %474 }
 0xc61   :  { %v477_v46 = vmul.f32 %v475_v44, %v466_v45 }
 0xc63   :  { %479 = vrot.lane.b32.xlu1 %v477_v46, %s872_s11 }
 0xcd5   :  { %v480_v48 = vpop.permute.xlu1 %479 }
 0xcd6   :  { %v482_v49 = vadd.f32 %v480_v48, %v472_v10 }
 0xcd8   :  { %801 = vtanh.f32 %v482_v49  ;;  %v540_v8 = vrot.slane %v482_v49, 6 }
 0xcde   :  { %v802_v50 = vpop.eup %801 }
 0xcdf   :  { %485 = vrot.lane.b32.xlu2 %v802_v50, %s871_s28  ;;  %v754_v50 = vld [vmem:[%s1121_s7] ss:$0 sm:$0xff]  ;;  %s874_s7 = smov [#allocation2]  }
 0xce0   :  { %s699_s23 = sshll.u32 %s874_s7, 4  ;;  %s700_s23 = int_to_ptr.vmem [resolvable:$true] %s699_s23 }
 0xd39   :  { %v486_v51 = vpop.permute.xlu2 %485 }
 0xd3a   :  { %v488_v52 = vmul.f32 %v486_v51, %v466_v45 }
 0xd3c   :  { %v490_v53 = vrot.slane %v488_v52, 2  ;;  %v635_v20 = vsel %vm629_vm14, %v1053_v26, %v488_v52 }
 0xd3e   :  { %491 = vrot.lane.b32.xlu0 %v490_v53, %s872_s11 }
 0xdb0   :  { %v492_v54 = vpop.permute.xlu0 %491 }
 0xdb1   :  { %742 = vmatmul.msk.f32.vlgmr.msrb.gmra.mxu0 %vm78_vm1, %v492_v54 }
 0xe2e   :  { %v512_v55 = vpop.f32.mrf.mxu0 }
 0xe2f   :  { %v516_v56 = vrot.slane %v512_v55, 4 }
 0xe31   :  { %v518_v57 = vadd.f32 %v516_v56, %v1047_v0 }
 0xe33   :  { %803 = vtanh.f32 %v518_v57  ;;  %v743_v59 = vmul.f32 -1.442695, %v518_v57 }
 0xe35   :  { %805 = vpow2.f32 %v743_v59 }
 0xe39   :  { %v804_v58 = vpop.eup %803 }
 0xe3a   :  { %544 = vrot.lane.b32.xlu1 %v804_v58, %s871_s28 }
 0xe3b   :  { %v806_v61 = vpop.eup %805 }
 0xe3c   :  { %v522_v62 = vadd.f32 1.0, %v806_v61 }
 0xe3e   :  { %807 = vrcp.f32 %v522_v62  ;;  %v534_v5 = vand.u32 2147483648, %v522_v62  ;;  %vm528_vm3 = vweird.f32 %v522_v62  ;;  %v532_v6 = vand.u32 2147483647, %v522_v62 }
 0xe40   :  { %v535_v9 = vor.u32 1.1754944e-38, %v534_v5  ;;  %vm533_vm5 = vcmp.eq.f32.partialorder %v532_v6, 8.507059e+37 }
 0xe44   :  { %v808_v63 = vpop.eup %807 }
 0xe45   :  { %v524_v1 = vmul.f32 %v808_v63, %v522_v62  ;;  %vm529_vm2 = vweird.f32 %v808_v63 }
 0xe46   :  { %vm530_vm4 = vmor %vm528_vm3, %vm529_vm2 }
 0xe47   :  { %v525_v2 = vsub.f32 1.0, %v524_v1 }
 0xe49   :  { %v526_v3 = vmul.f32 %v808_v63, %v525_v2 }
 0xe4b   :  { %v527_v4 = vadd.f32 %v808_v63, %v526_v3 }
 0xe4d   :  { %v531_v7 = vsel %vm530_vm4, %v808_v63, %v527_v4 }
 0xe4e   :  { %v536_v12 = vsel %vm533_vm5, %v535_v9, %v531_v7 }
 0xe4f   :  { %v542_v14 = vmul.f32 %v540_v8, %v536_v12 }
 0xeac   :  { %v545_v11 = vpop.permute.xlu1 %544 }
 0xead   :  { %v547_v13 = vmul.f32 %v545_v11, %v536_v12 }
 0xeaf   :  { %549 = vrot.lane.b32.xlu2 %v547_v13, %s872_s11 }
 0xf09   :  { %v550_v15 = vpop.permute.xlu2 %549 }
 0xf0a   :  { %v552_v16 = vadd.f32 %v550_v15, %v542_v14 }
 0xf0c   :  { %809 = vtanh.f32 %v552_v16  ;;  %v610_v46 = vrot.slane %v552_v16, 6 }
 0xf12   :  { %v810_v17 = vpop.eup %809 }
 0xf13   :  { %555 = vrot.lane.b32.xlu0 %v810_v17, %s871_s28 }
 0xf85   :  { %v556_v18 = vpop.permute.xlu0 %555 }
 0xf86   :  { %v558_v19 = vmul.f32 %v556_v18, %v536_v12 }
 0xf88   :  { %v560_v21 = vrot.slane %v558_v19, 4  ;;  %v1071_v22 = vsel %vm631_vm15, %v635_v20, %v558_v19 }
 0xf8a   :  { %561 = vrot.lane.b32.xlu1 %v560_v21, %s872_s11 }
 0xffc   :  { %v562_v23 = vpop.permute.xlu1 %561 }
 0xffd   :  { %744 = vmatmul.msk.f32.vlgmr.msra.gmra.mxu1 %vm78_vm1, %v562_v23 }
0x107a   :  { %v582_v24 = vpop.f32.mrf.mxu1 }
0x107b   :  { %v586_v25 = vrot.slane %v582_v24, 2 }
0x107d   :  { %v588_v27 = vadd.f32 %v586_v25, %v1047_v0  ;;  %v640_v0 = vld [vmem:[%s1120_s6 + $0x10] sm:$0xff] }
0x107e   :  { %669 = vmatpush.msrb.mxu2 %v640_v0 }
0x107f   :  { %811 = vtanh.f32 %v588_v27  ;;  %v745_v26 = vmul.f32 -1.442695, %v588_v27 }
0x1080   :  { %670 = vmatpush.msrb.mxu2 %v639_v32 }
0x1081   :  { %813 = vpow2.f32 %v745_v26 }
0x1085   :  { %v812_v28 = vpop.eup %811 }
0x1086   :  { %614 = vrot.lane.b32.xlu2 %v812_v28, %s871_s28 }
0x1087   :  { %v814_v29 = vpop.eup %813 }
0x1088   :  { %v592_v30 = vadd.f32 1.0, %v814_v29 }
0x108a   :  { %815 = vrcp.f32 %v592_v30  ;;  %v604_v39 = vand.u32 2147483648, %v592_v30  ;;  %vm598_vm15 = vweird.f32 %v592_v30  ;;  %v602_v40 = vand.u32 2147483647, %v592_v30 }
0x108c   :  { %v605_v41 = vor.u32 1.1754944e-38, %v604_v39  ;;  %vm603_vm7 = vcmp.eq.f32.partialorder %v602_v40, 8.507059e+37 }
0x108e   :  { %648 = vrot.lane.b32.xlu2 %v1038_v60, %s872_s11  ;;  %v638_v60 = vld [vmem:[%s1120_s6] sm:$0xff]  ;;  %s873_s6 = smov 96  }
0x108f   :  { %671 = vmatpush.msrb.mxu2 %v638_v60 }
0x1090   :  { %v816_v33 = vpop.eup %815 }
0x1091   :  { %v594_v34 = vmul.f32 %v816_v33, %v592_v30  ;;  %vm599_vm14 = vweird.f32 %v816_v33 }
0x1092   :  { %vm600_vm0 = vmor %vm598_vm15, %vm599_vm14 }
0x1093   :  { %v595_v35 = vsub.f32 1.0, %v594_v34 }
0x1095   :  { %v596_v37 = vmul.f32 %v816_v33, %v595_v35 }
0x1097   :  { %v597_v38 = vadd.f32 %v816_v33, %v596_v37 }
0x1099   :  { %v601_v36 = vsel %vm600_vm0, %v816_v33, %v597_v38 }
0x109a   :  { %v606_v43 = vsel %vm603_vm7, %v605_v41, %v601_v36 }
0x109b   :  { %v612_v47 = vmul.f32 %v610_v46, %v606_v43 }
0x10e0   :  { %v615_v42 = vpop.permute.xlu2 %614 }
0x10e1   :  { %v617_v44 = vmul.f32 %v615_v42, %v606_v43 }
0x10e3   :  { %619 = vrot.lane.b32.xlu0 %v617_v44, %s872_s11 }
0x10e8   :  { %v649_v45 = vpop.permute.xlu2 %648 }
0x10e9   :  { %746 = vmatmul.msk.f32.vlgmr.msrb.gmra.mxu2 %vm78_vm1, %v649_v45 }
0x1155   :  { %v620_v10 = vpop.permute.xlu0 %619 }
0x1156   :  { %v622_v48 = vadd.f32 %v620_v10, %v612_v47 }
0x1158   :  { %817 = vtanh.f32 %v622_v48  ;;  %688 = vrot.lane.b32.xlu2 %v622_v48, %s873_s6 }
0x115e   :  { %v818_v49 = vpop.eup %817 }
0x115f   :  { %625 = vrot.lane.b32.xlu1 %v818_v49, %s871_s28  ;;  %s712_s28 = sshll.u32 %s1124_s10, 4  ;;  %s713_s28 = int_to_ptr.hbm [resolvable:$true] %s712_s28 }
0x116c   :  { %v673_v51 = vpop.f32.mrf.mxu2 }
0x116d   :  { %v674_v52 = vadd.f32 %v754_v50, %v673_v51 }
0x116f   :  { %679 = vst [vmem:[%s1122_s8] sm:$0xff] %v674_v52 }
0x11b2   :  { %v689_v53 = vpop.permute.xlu2 %688 }
0x11b3   :  { %691 = vst.msk [vmem:[#allocation4 - $0x6] sm:$0xc0] %vm685_vm8, %v689_v53 }
0x11b4   :  { %715 = dma.vmem_to_hbm [thread:$0]  %s711_s27, 32, %s713_s28, [#allocation5]  }
0x11d1   :  { %v626_v54 = vpop.permute.xlu1 %625 }
0x11d2   :  { %v628_v55 = vmul.f32 %v626_v54, %v606_v43 }
0x11d4   :  { %682 = vrot.lane.b32.xlu1 %v628_v55, %s872_s11  ;;  %v637_v56 = vsel %vm633_vm6, %v1071_v22, %v628_v55 }
0x11d5   :  { %650 = vrot.lane.b32.xlu0 %v637_v56, %s872_s11 }
0x1246   :  { %v683_v57 = vpop.permute.xlu1 %682 }
0x1247   :  { %686 = vst.msk [vmem:[#allocation2 - $0x6] sm:$0xc0] %vm685_vm8, %v683_v57  ;;  %v651_v58 = vpop.permute.xlu0 %650 }
0x1248   :  { %747 = vmatmul.msk.f32.gmra.mxu2 %vm78_vm1, %v651_v58  ;;  %704 = dma.vmem_to_hbm [thread:$0]  %s700_s23, 32, %s702_s25, [#allocation3]  }
0x12cb   :  { %v676_v59 = vpop.f32.mrf.mxu2 }
0x12cc   :  { %v677_v61 = vadd.f32 %v754_v50, %v676_v59 }
0x12ce   :  { %680 = vst [vmem:[%s1122_s8 + $0x8] sm:$0xff] %v677_v61 }
0x12cf   :  { %867 = dma.done.wait [#allocation3], 32  }
0x12d0   :  { %868 = vsyncadd [#allocation3], 4294967264 }
0x12d1   :  { %869 = dma.done.wait [#allocation5], 32  }
0x12d2   :  { %870 = vsyncadd [#allocation5], 4294967264 }
0x12d3   :  { %726 = vsyncpa [#allocation3], 1 }
0x12d4   :  { %727 = vsyncpa [#allocation5], 1 }

</bundles_post_ra>
